<compile_context>
chip_gen: v7x
topology: tpu7x:2x2x1
jax: 0.10.0
libtpu: 0.0.40
codegen_flags: <defaults>
</compile_context>

<pallas_src>
import jax
import jax.numpy as jnp
from jax.experimental import pallas as pl
from jax.experimental.pallas import tpu as pltpu


def _round_up(x: int, m: int) -> int:
    return ((x + m - 1) // m) * m


def _pad2(x, rows: int, cols: int):
    r, c = x.shape
    return jnp.pad(x, ((0, rows - r), (0, cols - c)))


# --------------------------------------------------------------------------
# Pass 1: h = x @ W^T + b   (tiled over node rows and hidden columns).
# Emits f32 h (for the finalize residual) and bf16 h (MXU column operand).
# --------------------------------------------------------------------------
def linear_kernel(x_ref, wt_ref, b_ref, h32_ref, h16_ref):
    h = (
        jnp.dot(x_ref[...], wt_ref[...], preferred_element_type=jnp.float32)
        + b_ref[...]
    )
    h32_ref[...] = h
    h16_ref[...] = h.astype(jnp.bfloat16)


# --------------------------------------------------------------------------
# Pass 2: agg = A @ h ; out = (h + agg) * inv_deg
#   grid = (rows i [parallel], A-columns k [arbitrary, reduction])
# --------------------------------------------------------------------------
def gcn_agg_kernel(a_ref, hcol_ref, hrow_ref, invdeg_ref, o_ref, acc_ref):
    k = pl.program_id(1)

    @pl.when(k == 0)
    def _init():
        acc_ref[...] = jnp.zeros_like(acc_ref)

    # bf16 x bf16 -> f32 accumulate: full MXU rate, no f32 A-tile temp.
    acc_ref[...] += jnp.dot(
        a_ref[...], hcol_ref[...], preferred_element_type=jnp.float32
    )

    @pl.when(k == pl.num_programs(1) - 1)
    def _finalize():
        # inv_deg = 1 / (deg + 1), precomputed on the wrapper side (O(E)).
        o_ref[...] = (
            (hrow_ref[...] + acc_ref[...]) * invdeg_ref[...]
        ).astype(o_ref.dtype)


# --------------------------------------------------------------------------
# Tile selection (VMEM-capacity aware, hp aware).
# --------------------------------------------------------------------------
def _vmem_budget():
    try:
        phys = int(pltpu.get_tpu_info().vmem_capacity_bytes)
    except Exception:
        phys = 64 * 1024 * 1024  # conservative v7x-safe fallback
    vmem_limit = max(32 * 1024 * 1024, min(phys * 3 // 4, 100 * 1024 * 1024))
    tile_budget = int(vmem_limit * 0.85)  # headroom for Mosaic internals
    return vmem_limit, tile_budget


def _pick_agg_tiles(n, hp, tile_budget):
    """Pick (tm, tk, n_pad) for the aggregation pass under a VMEM budget."""
    n128 = _round_up(max(n, 1), 128)
    tm_sel, tk_sel = 8, 128
    done = False
    for tm in (2048, 1024, 512, 256, 128, 64, 32, 16, 8):  # prefer large tm:
        if tm > n128:                                       # less hcol re-stream
            continue
        for tk in (2048, 1024, 512, 256, 128):
            if tk > n128:
                continue
            usage = (
                2 * tm * tk * 2        # A tile (bf16), double-buffered
                + 2 * tk * hp * 2      # h column stream (bf16)
                + 2 * tm * hp * 4      # h row tile (f32)
                + 2 * tm * 128 * 4     # inv-degree tile (lane-padded)
                + 2 * tm * hp * 4      # output tile
                + tm * hp * 4          # f32 accumulator scratch
            )
            if usage <= tile_budget:
                tm_sel, tk_sel = tm, tk
                done = True
                break
        if done:
            break
    n_pad = _round_up(max(n, 1), max(tm_sel, tk_sel))
    # Guarantee >= 2 blocks on the "parallel" row axis (v7x: 2 TensorCores).
    while n_pad // tm_sel < 2 and tm_sel > 8:
        tm_sel //= 2
    return tm_sel, tk_sel, n_pad


def _pick_linear_tiles(n_pad, hp, tile_budget):
    """Pick (tm, tn) for the linear pass under a VMEM budget."""
    tm_sel, tn_sel = 8, 128
    done = False
    for tm in (1024, 512, 256, 128, 64, 32, 16, 8):
        if n_pad % tm != 0:
            continue
        for tn in (hp, 1024, 512, 256, 128):
            if tn > hp or hp % tn != 0:
                continue
            usage = (
                2 * tm * hp * 4      # x tile
                + 2 * hp * tn * 4    # W^T tile
                + 2 * 8 * tn * 4     # bias (sublane-padded)
                + 2 * tm * tn * 4    # h f32 out
                + 2 * tm * tn * 2    # h bf16 out
            )
            if usage <= tile_budget:
                tm_sel, tn_sel = tm, tn
                done = True
                break
        if done:
            break
    while n_pad // tm_sel < 2 and tm_sel > 8:
        tm_sel //= 2
    return tm_sel, tn_sel


# --------------------------------------------------------------------------
# Wrapper
# --------------------------------------------------------------------------
def gcn_main_block(node_attr, edge_index, weight, bias):
    """node_attr: [N, H] f32, edge_index: [2, E] int, weight: [H, H], bias: [H]."""
    n, h = node_attr.shape
    hp = _round_up(h, 128)  # lane-dense hidden dim

    vmem_limit, tile_budget = _vmem_budget()
    tm2, tk2, n_pad = _pick_agg_tiles(n, hp, tile_budget)
    tm1, tn1 = _pick_linear_tiles(n_pad, hp, tile_budget)

    x_p = _pad2(node_attr.astype(jnp.float32), n_pad, hp)
    wt_p = _pad2(weight.T.astype(jnp.float32), hp, hp)
    b_p = _pad2(bias.astype(jnp.float32).reshape(1, h), 1, hp)

    src = edge_index[0].astype(jnp.int32)
    dst = edge_index[1].astype(jnp.int32)

    # Dense adjacency counts: accumulated in f32 (exact), stored as bf16 for
    # the MXU (exact for per-pair edge multiplicities <= 256, correctly
    # rounded beyond).
    adj = (
        jnp.zeros((n_pad, n_pad), dtype=jnp.float32)
        .at[src, dst]
        .add(1.0)
        .astype(jnp.bfloat16)
    )

    # Degree (+1 self term) precomputed wrapper-side: O(E), removes the
    # in-kernel XLU row-sum and the f32 A-tile view it forced.
    deg = jnp.zeros((n_pad,), jnp.float32).at[src].add(1.0)
    inv_deg = (1.0 / (deg + 1.0)).reshape(n_pad, 1)

    # ---- Pass 1: linear layer (emits f32 and bf16 copies of h) ----
    h32, h16 = pl.pallas_call(
        linear_kernel,
        out_shape=(
            jax.ShapeDtypeStruct((n_pad, hp), jnp.float32),
            jax.ShapeDtypeStruct((n_pad, hp), jnp.bfloat16),
        ),
        grid_spec=pltpu.PrefetchScalarGridSpec(
            num_scalar_prefetch=0,
            grid=(n_pad // tm1, hp // tn1),
            in_specs=[
                pl.BlockSpec((tm1, hp), lambda i, j: (i, 0)),   # x row tile
                pl.BlockSpec((hp, tn1), lambda i, j: (0, j)),   # W^T column tile
                pl.BlockSpec((1, tn1), lambda i, j: (0, j)),    # bias
            ],
            out_specs=[
                pl.BlockSpec((tm1, tn1), lambda i, j: (i, j)),  # h (f32)
                pl.BlockSpec((tm1, tn1), lambda i, j: (i, j)),  # h (bf16)
            ],
        ),
        compiler_params=pltpu.CompilerParams(
            dimension_semantics=("parallel", "parallel"),
            vmem_limit_bytes=vmem_limit,
        ),
    )(x_p, wt_p, b_p)

    # ---- Pass 2: aggregation + normalize ----
    out_p = pl.pallas_call(
        gcn_agg_kernel,
        out_shape=jax.ShapeDtypeStruct((n_pad, hp), node_attr.dtype),
        grid_spec=pltpu.PrefetchScalarGridSpec(
            num_scalar_prefetch=0,
            grid=(n_pad // tm2, n_pad // tk2),
            in_specs=[
                pl.BlockSpec((tm2, tk2), lambda i, k: (i, k)),  # A tile (bf16)
                pl.BlockSpec((tk2, hp), lambda i, k: (k, 0)),   # h cols (bf16)
                pl.BlockSpec((tm2, hp), lambda i, k: (i, 0)),   # h rows (f32)
                pl.BlockSpec((tm2, 1), lambda i, k: (i, 0)),    # 1/(deg+1)
            ],
            out_specs=pl.BlockSpec((tm2, hp), lambda i, k: (i, 0)),
            scratch_shapes=[
                pltpu.VMEM((tm2, hp), jnp.float32),  # agg accumulator
            ],
        ),
        compiler_params=pltpu.CompilerParams(
            dimension_semantics=("parallel", "arbitrary"),
            vmem_limit_bytes=vmem_limit,
        ),
    )(adj, h16, h32, inv_deg)

    return out_p[:n, :h]


# --------------------------------------------------------------------------
# Pure-JAX reference matching the PyTorch forward exactly.
# --------------------------------------------------------------------------
def reference(node_attr, edge_index, weight, bias):
    n = node_attr.shape[0]
    h = node_attr @ weight.T + bias
    gathered = h[edge_index[1]]                                   # [E, H]
    agg = jnp.zeros_like(h).at[edge_index[0]].add(gathered)       # scatter_sum
    deg = jnp.zeros((n,), jnp.float32).at[edge_index[0]].add(1.0) + 1.0
    return (h + agg) / deg[:, None]


if __name__ == "__main__":
    key = jax.random.PRNGKey(0)
    k_x, k_w, k_b, k_src, k_dst = jax.random.split(key, 5)

    num_nodes = 8
    hidden_dim = 32
    num_edges = 24

    # Deterministic synthetic parameters (nn.Linear(hidden, hidden) shapes).
    bound = 1.0 / (hidden_dim ** 0.5)
    weight = jax.random.uniform(
        k_w, (hidden_dim, hidden_dim), minval=-bound, maxval=bound, dtype=jnp.float32
    )
    bias = jax.random.uniform(
        k_b, (hidden_dim,), minval=-bound, maxval=bound, dtype=jnp.float32
    )

    node_attr = jax.random.normal(k_x, (num_nodes, hidden_dim), dtype=jnp.float32)
    src = jax.random.randint(k_src, (num_edges,), 0, num_nodes, dtype=jnp.int32)
    dst = jax.random.randint(k_dst, (num_edges,), 0, num_nodes, dtype=jnp.int32)
    edge_index = jnp.stack([src, dst], axis=0)  # [2, E]

    out = gcn_main_block(node_attr, edge_index, weight, bias)
    out = jax.block_until_ready(out)

    ref = reference(node_attr, edge_index, weight, bias)
    assert out.shape == ref.shape, "shape mismatch vs reference"
    # bf16 aggregation operands (f32 accumulation) -> ~1e-3 relative error.
    assert jnp.allclose(out, ref, atol=1e-2, rtol=1e-2), "mismatch vs reference"

    print("KERNEL_OK")
</pallas_src>

<mosaic_0001>
module attributes {stable_mosaic.version = 11 : i64} {
  func.func @linear_kernel(%arg0: i32, %arg1: i32, %arg2: memref<64x128xf32, #tpu.memory_space<vmem>>, %arg3: memref<128x128xf32, #tpu.memory_space<vmem>>, %arg4: memref<1x128xf32, #tpu.memory_space<vmem>>, %arg5: memref<64x128xf32, #tpu.memory_space<vmem>>, %arg6: memref<64x128xbf16, #tpu.memory_space<vmem>>) attributes {dimension_semantics = [#tpu.dimension_semantics<parallel>, #tpu.dimension_semantics<parallel>], iteration_bounds = array<i64: 2, 1>, scalar_prefetch = 0 : i64, scratch_operands = 0 : i64, tpu.core_type = #tpu.core_type<tc>, window_params = [{transform_indices = @transform_0, window_bounds = array<i64: 64, 128>}, {transform_indices = @transform_1, window_bounds = array<i64: 128, 128>}, {transform_indices = @transform_2, window_bounds = array<i64: 1, 128>}, {transform_indices = @transform_3, window_bounds = array<i64: 64, 128>}, {transform_indices = @transform_4, window_bounds = array<i64: 64, 128>}]} {
    %c0 = arith.constant 0 : index
    %c0_0 = arith.constant 0 : index
    %0 = vector.load %arg2[%c0, %c0_0] : memref<64x128xf32, #tpu.memory_space<vmem>>, vector<64x128xf32>
    %c0_1 = arith.constant 0 : index
    %c0_2 = arith.constant 0 : index
    %1 = vector.load %arg3[%c0_1, %c0_2] : memref<128x128xf32, #tpu.memory_space<vmem>>, vector<128x128xf32>
    %cst = arith.constant dense<0.000000e+00> : vector<64x128xf32>
    %2 = tpu.matmul %0, %1, %cst {dimension_numbers = #tpu.dot_dimension_numbers<[1], [0], [0], [1], [0, 0, 1, 1], [], []>} : vector<64x128xf32>, vector<128x128xf32>, vector<64x128xf32> -> vector<64x128xf32>
    %c0_3 = arith.constant 0 : index
    %c0_4 = arith.constant 0 : index
    %3 = vector.load %arg4[%c0_3, %c0_4] : memref<1x128xf32, #tpu.memory_space<vmem>>, vector<1x128xf32>
    %4 = vector.broadcast %3 : vector<1x128xf32> to vector<64x128xf32>
    %5 = arith.addf %2, %4 : vector<64x128xf32>
    %c0_5 = arith.constant 0 : index
    %c0_6 = arith.constant 0 : index
    %6 = vector.load %arg5[%c0_5, %c0_6] : memref<64x128xf32, #tpu.memory_space<vmem>>, vector<64x128xf32>
    tpu.vector_store %arg5[%c0_5, %c0_6], %5 {strides = array<i32>} : memref<64x128xf32, #tpu.memory_space<vmem>>, vector<64x128xf32>,
    %7 = arith.truncf %5 : vector<64x128xf32> to vector<64x128xbf16>
    %c0_7 = arith.constant 0 : index
    %c0_8 = arith.constant 0 : index
    %8 = vector.load %arg6[%c0_7, %c0_8] : memref<64x128xbf16, #tpu.memory_space<vmem>>, vector<64x128xbf16>
    tpu.vector_store %arg6[%c0_7, %c0_8], %7 {strides = array<i32>} : memref<64x128xbf16, #tpu.memory_space<vmem>>, vector<64x128xbf16>,
    return
  }
  func.func @transform_0(%arg0: i32, %arg1: i32) -> (i32, i32) {
    %c0_i32 = arith.constant 0 : i32
    %c0_i32_0 = arith.constant 0 : i32
    return %arg0, %c0_i32 : i32, i32
  }
  func.func @transform_1(%arg0: i32, %arg1: i32) -> (i32, i32) {
    %c0_i32 = arith.constant 0 : i32
    %c0_i32_0 = arith.constant 0 : i32
    return %c0_i32, %arg1 : i32, i32
  }
  func.func @transform_2(%arg0: i32, %arg1: i32) -> (i32, i32) {
    %c0_i32 = arith.constant 0 : i32
    %c0_i32_0 = arith.constant 0 : i32
    return %c0_i32, %arg1 : i32, i32
  }
  func.func @transform_3(%arg0: i32, %arg1: i32) -> (i32, i32) {
    %c0_i32 = arith.constant 0 : i32
    return %arg0, %arg1 : i32, i32
  }
  func.func @transform_4(%arg0: i32, %arg1: i32) -> (i32, i32) {
    %c0_i32 = arith.constant 0 : i32
    return %arg0, %arg1 : i32, i32
  }
}

</mosaic_0001>

<bundles_post_ra>
// kernel: tpu_custom_call.1
= control target key start
LH: loop header
LB: loop body
LE: loop exit
PB: predicated region body
PF: predicated region fallthrough
CT: control target
= control target key end

     0   :  { %10 = vsyncpa [#allocation3], 0  ;;  %s1415_s0 = inlined_call_operand.hbm [shape: f32[128,128], index: 0, kind: input, shape index: {}]   ;;  %s1416_s1 = inlined_call_operand.hbm [shape: f32[128,128], index: 1, kind: input, shape index: {}]   ;;  %s1417_s2 = inlined_call_operand.vmem [shape: f32[1,128], index: 2, kind: input, shape index: {}]   ;;  %s1418_s3 = inlined_call_operand.hbm [shape: f32[128,128], index: 3, kind: output, shape index: {0}]   ;;  %s1419_s4 = inlined_call_operand.hbm [shape: bf16[128,128], index: 4, kind: output, shape index: {1}]  }
   0x1   :  { %12 = vsyncpa [#allocation3 + $0x1], 0 }
   0x2   :  { %13 = vsyncpa [#allocation6], 0 }
   0x3   :  { %14 = vsyncpa [#allocation4], 0 }
   0x4   :  { %16 = vsyncpa [#allocation4 + $0x1], 0 }
   0x5   :  { %17 = vsyncpa [#allocation9], 0 }
   0x6   :  { %19 = vsyncpa [#allocation9 + $0x1], 0  ;;  %s1122_s15 = smov 0   ;;  %s1124_s16 = smov 0  }
   0x7   :  { %s1126_s17 = smov 0   ;;  %s1128_s18 = smov 0  }
   0x8   :  { %s1130_s19 = smov 0   ;;  %s1132_s20 = smov 0  }
   0x9 LB: > { %s644_s21 = sadd.s32 4294967295, %s1085_s20   ;;  %s645_s22 = sadd.s32 4294967294, %s1085_s20   ;;  %s1085_s20 = sphi %s1132_s20, %s25_s20   ;;  %s1081_s19 = sphi %s1130_s19, %s1443_s19   ;;  %s1077_s18 = sphi %s1128_s18, %s1442_s18   ;;  %s1073_s17 = sphi %s1126_s17, %s1441_s17   ;;  %s1069_s16 = sphi %s1124_s16, %s1440_s16   ;;  %s1065_s15 = sphi %s1122_s15, %s1439_s15  }
   0xa   : > { %p57_p0 = scmp.ne.s32.totalorder %s1069_s16, %s1065_s15  ;;  %p1156_p1 = scmp.eq.s32.totalorder %s644_s21, 0 }
   0xb   : > { %p1160_p2 = scmp.eq.s32.totalorder %s644_s21, 1  ;;  %p141_p3 = scmp.eq.s32.totalorder %s645_s22, 1 }
   0xc   : > { %s1424_s23 = scalar_select %p1156_p1, 1, 0 }
   0xd   : > { %s1425_s24 = scalar_select %p1160_p2, 1, 0 }
   0xe   : > { %p1166_p4 = por %p1156_p1, %p57_p0  ;;  %p646_p5 = scmp.ge.s32.totalorder %s1085_s20, 1 }
   0xf   : > { %p1171_p6 = por %p141_p3, %p57_p0  ;;  %p176_p7 = scmp.lt.s32.totalorder %s1085_s20, 3 }
  0x10   : > { %s1426_s25 = scalar_select %p1166_p4, 1, 0 }
  0x11   : > { %s1427_s26 = scalar_select %p1171_p6, 1, 0 }
  0x12   : > { %p1176_p8 = pnand %p646_p5, %p176_p7  ;;  %s1087_s28 = smov [#allocation5]  }
  0x13   : > { %s190_s29 = sshll.u32 %s1087_s28, 4  ;;  %s37_s5 = sadd.s32 1, %s1081_s19  ;;  %s191_s29 = int_to_ptr.vmem [resolvable:$true] %s190_s29 }
  0x14   : > { %s1428_s27 = scalar_select %p1176_p8, 1, 0 }
  0x15   : > { %p835_p9 = pneg %p1176_p8  ;;  %s909_s8 = scalar_lea.hbm %s1416_s1, 2048 }
  0x16   : > { %p910_p12 = scmp.ne.s32.totalorder %s1416_s1, %s909_s8  ;;  %p916_p5 = scmp.lt.u32.totalorder %s909_s8, %s1416_s1 }
  0x17   : > { %p1185_p11 = pnand %p835_p9, %p1156_p1 }
  0x19   : > { %p911_p13 = pneg %p1185_p11 }
  0x1b   : > { %p912_p0 = pnand %p911_p13, %p910_p12 }
  0x1d   : > { %p913_p3 = pneg %p912_p0 }
  0x1f   : > { %p918_p7 = pnand %p916_p5, %p913_p3 }
  0x21   : > { %921 = shalt.err (!%p918_p7)
}
  0x22   : > { %s922_s13 = scalar_lea.vmem %s191_s29, 2048  ;;  %p930_p1 = scmp.lt.s32.totalorder %s191_s29, %s191_s29 }
  0x23   : > { %p923_p9 = scmp.ne.s32.totalorder %s191_s29, %s922_s13  ;;  %p931_p4 = scmp.lt.s32.totalorder %s922_s13, %s922_s13 }
  0x25   : > { %p925_p10 = pnand %p923_p9, %p911_p13  ;;  %p932_p8 = por %p931_p4, %p930_p1 }
  0x27   : > { %p926_p6 = pneg %p925_p10 }
  0x29   : > { %p933_p2 = pnand %p932_p8, %p926_p6 }
  0x2b   : > { %936 = shalt.err (!%p933_p2)
}
  0x2c   : > { %s1088_s14 = smov 128   ;;  %s1089_s21 = smov 8  }
  0x2d   : > { %838 = dma.hbm_to_vmem [thread:$0]  (!%p1185_p11), %s1416_s1, 2048, %s191_s29, [#allocation6], %s1088_s14, %s1088_s14, %s1089_s21  }
  0x2e   : > { %p39_p1 = scmp.ge.s32.totalorder %s37_s5, 2  ;;  %s44_s6 = sadd.s32 1, %s1073_s17 }
  0x2f   : > { %p51_p2 = scmp.ne.s32.totalorder %s1073_s17, %s1069_s16  ;;  %p52_p4 = scmp.eq.s32.totalorder %s1085_s20, 0 }
  0x30   : > { %s1445_s5 = smov (%p39_p1, %s37_s5), 0  ;;  %p1431_p8 = scmp.ne.s32.totalorder %s1425_s24, 0 }
  0x31   : > { %p1215_p6 = por %p52_p4, %p51_p2  ;;  %s41_s8 = ssub.s32 %s1081_s19, %s1445_s5 }
  0x32   : > { %p1221_p10 = por %p1431_p8, %p51_p2  ;;  %p851_p12 = scmp.lt.s32.totalorder %s1085_s20, 2 }
  0x33   : > { %p42_p11 = scmp.eq.s32.totalorder %s41_s8, 0  ;;  %s210_s29 = sand.u32 1, %s1073_s17  }
  0x34   : > { %s650_s9 = sshll.u32 %s210_s29, 6  ;;  %s675_s11 = sshll.u32 %s1081_s19, 10 }
  0x35   : > { %s1230_s10 = scalar_select %p42_p11, %s1073_s17, %s44_s6  }
  0x36   : > { %s1236_s22 = scalar_lea.hbm %s1415_s0, %s675_s11  ;;  %s214_s24 = scalar_lea.vmem [#allocation2], %s650_s9 }
  0x37   : > { %s221_s28 = sshll.u32 %s214_s24, 4  ;;  %p1242_p13 = pnand %p851_p12, %p1215_p6  ;;  %s1238_s28 = int_to_ptr.vmem [resolvable:$true] %s221_s28 }
  0x38   : > { %s1246_s6 = scalar_lea.sflag [#allocation3], %s210_s29  ;;  %s937_s12 = scalar_lea.hbm %s1236_s22, 1024 }
  0x39   : > { %p938_p0 = scmp.ne.s32.totalorder %s1236_s22, %s937_s12  ;;  %p939_p3 = pneg %p1242_p13 }
  0x3a   : > { %s942_s7 = scalar_lea.hbm %s1415_s0, 2048  ;;  %p943_p9 = scmp.lt.u32.totalorder %s1236_s22, %s1415_s0 }
  0x3b   : > { %p940_p5 = pnand %p939_p3, %p938_p0  ;;  %p944_p1 = scmp.lt.u32.totalorder %s942_s7, %s937_s12 }
  0x3c   : > { %p946_p4 = scmp.lt.u32.totalorder %s937_s12, %s1236_s22 }
  0x3d   : > { %p941_p7 = pneg %p940_p5  ;;  %p945_p2 = por %p944_p1, %p943_p9 }
  0x3f   : > { %p947_p6 = por %p946_p4, %p945_p2 }
  0x41   : > { %p948_p8 = pnand %p947_p6, %p941_p7 }
  0x43   : > { %951 = shalt.err (!%p948_p8)
}
  0x44   : > { %s952_s29 = scalar_lea.vmem %s1238_s28, 1024  ;;  %s1090_s9 = smov [#allocation2]  }
  0x45   : > { %p953_p12 = scmp.ne.s32.totalorder %s1238_s28, %s952_s29  ;;  %s957_s11 = sshll.u32 %s1090_s9, 4  ;;  %s958_s11 = int_to_ptr.vmem [resolvable:$false] %s957_s11 }
  0x46   : > { %s959_s13 = scalar_lea.vmem %s958_s11, 2048  ;;  %p960_p5 = scmp.lt.s32.totalorder %s1238_s28, %s958_s11 }
  0x47   : > { %p955_p11 = pnand %p953_p12, %p939_p3  ;;  %p961_p9 = scmp.lt.s32.totalorder %s959_s13, %s952_s29 }
  0x49   : > { %p956_p0 = pneg %p955_p11  ;;  %p962_p1 = por %p961_p9, %p960_p5 }
  0x4b   : > { %p963_p2 = pnand %p962_p1, %p956_p0 }
  0x4d   : > { %966 = shalt.err (!%p963_p2)
}
  0x4e   : > { %842 = dma.hbm_to_vmem [thread:$0]  (!%p1242_p13), %s1236_s22, 1024, %s1238_s28, %s1246_s6, %s1088_s14, %s1088_s14, %s1089_s21  }
  0x4f   : > { %p1434_p3 = scmp.ne.s32.totalorder %s1428_s27, 0 }
  0x50   : > { %s1280_s12 = sand.u32 (!%p1434_p3), 1, %s1069_s16   ;;  %p1435_p7 = scmp.ne.s32.totalorder (!%p1434_p3), %s1426_s25, 0 }
  0x51   : > { %233 = sbr.rel (%p1434_p3) target bundleno = 385 (0x181), region = 32  ;;  %s654_s7 = sshll.u32 (!%p1434_p3), %s1280_s12, 6 }
  0x52   : > { %s236_s24 = scalar_lea.sflag (!%p1434_p3), [#allocation3], %s1280_s12  ;;  %s1286_s8 = scalar_lea.vmem (!%p1434_p3), [#allocation2], %s654_s7 }
  0x58   : > { %1048 = dma.done.wait (%p1435_p7), %s236_s24, 1024  }
  0x59   : > { %1050 = vsyncadd (%p1435_p7), %s236_s24, 4294966272  ;;  %p1436_p13 = scmp.ne.s32.totalorder %s1424_s23, 0 }
  0x5b   : > { %1052 = dma.done.wait (%p1436_p13), [#allocation6], 2048  }
  0x5c   : > { %1054 = vsyncadd (%p1436_p13), [#allocation6], 4294965248  ;;  %v290_v0 = vld [vmem:[#allocation5] sm:$0xff]  ;;  %v291_v1 = vld [vmem:[#allocation5 + $0x8] sm:$0xff]  ;;  %s657_s23 = sshll.u32 %s1280_s12, 5  ;;  %s1310_s14 = scalar_lea.vmem [#allocation7], %s654_s7 }
  0x5d   : > { %v292_v2 = vld [vmem:[#allocation5 + $0x10] sm:$0xff]  ;;  %v777_v3 = vpack.c.bf16 %v291_v1, %v290_v0  ;;  %v293_v4 = vld [vmem:[#allocation5 + $0x18] sm:$0xff]  ;;  %v294_v6 = vld [vmem:[#allocation5 + $0x20] sm:$0xff]  ;;  %s486_s21 = sshll.u32 %s1310_s14, 4  ;;  %s1313_s22 = scalar_lea.vmem [#allocation8], %s657_s23  ;;  %s1318_s21 = int_to_ptr.vmem [resolvable:$true] %s486_s21 }
  0x5e   : > { %v781_v5 = vpack.c.bf16 %v293_v4, %v292_v2  ;;  %v295_v7 = vld [vmem:[#allocation5 + $0x28] sm:$0xff]  ;;  %v282_v9 = vld [vmem:[%s1286_s8] sm:$0xff]  ;;  %v296_v11 = vld [vmem:[#allocation5 + $0x30] sm:$0xff]  ;;  %s503_s28 = sshll.u32 %s1313_s22, 4  ;;  %s684_s6 = sshll.u32 %s1077_s18, 10  ;;  %s1322_s28 = int_to_ptr.vmem [resolvable:$true] %s503_s28 }
  0x5f   : > { %778 = vmatprep.subr.bf16.mxu0 %v777_v3  ;;  %809 = vmatprep.subr.bf16.mxu1 %v777_v3  ;;  %v785_v8 = vpack.c.bf16 %v295_v7, %v294_v6  ;;  %v286_v10 = vld [vmem:[%s1286_s8 + $0x20] sm:$0xff]  ;;  %v297_v12 = vld [vmem:[#allocation5 + $0x38] sm:$0xff]  ;;  %v299_v15 = vld [vmem:[#allocation5 + $0x48] sm:$0xff]  ;;  %s685_s29 = sshll.u32 %s1077_s18, 9  ;;  %s1329_s13 = scalar_lea.hbm %s1418_s3, %s684_s6 }
  0x60   : > { %780 = vmatpush3.bf16.msra.mxu0 %v777_v3  ;;  %817 = vmatpush3.bf16.msra.mxu1 %v777_v3  ;;  %v789_v13 = vpack.c.bf16 %v297_v12, %v296_v11  ;;  %v298_v14 = vld [vmem:[#allocation5 + $0x40] sm:$0xff]  ;;  %v300_v17 = vld [vmem:[#allocation5 + $0x50] sm:$0xff]  ;;  %v301_v18 = vld [vmem:[#allocation5 + $0x58] sm:$0xff]  ;;  %s1338_s24 = scalar_lea.hbm %s1419_s4, %s685_s29  ;;  %s967_s23 = scalar_lea.vmem %s1318_s21, 1024 }
  0x61   : > { %782 = vmatprep.subr.bf16.mxu0 %v781_v5  ;;  %810 = vmatprep.subr.bf16.mxu1 %v781_v5  ;;  %v793_v16 = vpack.c.bf16 %v299_v15, %v298_v14  ;;  %v797_v19 = vpack.c.bf16 %v301_v18, %v300_v17  ;;  %v302_v20 = vld [vmem:[#allocation5 + $0x60] sm:$0xff]  ;;  %v303_v21 = vld [vmem:[#allocation5 + $0x68] sm:$0xff]  ;;  %v304_v23 = vld [vmem:[#allocation5 + $0x70] sm:$0xff]  ;;  %p968_p4 = scmp.ne.s32.totalorder %s1318_s21, %s967_s23  ;;  %s1091_s25 = smov [#allocation7]  }
  0x62   : > { %765 = vmatprep.mubr.f32.mxu0 %v282_v9  ;;  %771 = vmatprep.mubr.f32.mxu1 %v286_v10  ;;  %v801_v22 = vpack.c.bf16 %v303_v21, %v302_v20  ;;  %v305_v24 = vld [vmem:[#allocation5 + $0x78] sm:$0xff]  ;;  %v283_v26 = vld [vmem:[%s1286_s8 + $0x8] sm:$0xff]  ;;  %v284_v28 = vld [vmem:[%s1286_s8 + $0x10] sm:$0xff]  ;;  %s971_s27 = sshll.u32 %s1091_s25, 4  ;;  %s972_s27 = int_to_ptr.vmem [resolvable:$false] %s971_s27 }
  0x63   : > { %v805_v25 = vpack.c.bf16 %v305_v24, %v304_v23  ;;  %v287_v27 = vld [vmem:[%s1286_s8 + $0x28] sm:$0xff]  ;;  %v288_v29 = vld [vmem:[%s1286_s8 + $0x30] sm:$0xff]  ;;  %v285_v30 = vld [vmem:[%s1286_s8 + $0x18] sm:$0xff]  ;;  %p969_p6 = pnand %p968_p4, %p1221_p10  ;;  %s973_s6 = scalar_lea.vmem %s972_s27, 2048 }
  0x64   : > { %784 = vmatpush3.bf16.msra.mxu0 %v781_v5  ;;  %818 = vmatpush3.bf16.msra.mxu1 %v781_v5  ;;  %v289_v31 = vld [vmem:[%s1286_s8 + $0x38] sm:$0xff]  ;;  %v658_v32 = vld [vmem:[%s1417_s2] ss:$0 sm:$0xff]  ;;  %s467_s8 = scalar_lea.sflag [#allocation4], %s1280_s12  ;;  %p974_p12 = scmp.lt.s32.totalorder %s1318_s21, %s972_s27 }
  0x65   : > { %786 = vmatprep.subr.bf16.mxu0 %v785_v8  ;;  %811 = vmatprep.subr.bf16.mxu1 %v785_v8  ;;  %p970_p8 = pneg %p969_p6  ;;  %p975_p11 = scmp.lt.s32.totalorder %s973_s6, %s967_s23 }
  0x67   : > { %p976_p0 = por %p975_p11, %p974_p12 }
  0x68   : > { %788 = vmatpush3.bf16.msra.mxu0 %v785_v8  ;;  %819 = vmatpush3.bf16.msra.mxu1 %v785_v8 }
  0x69   : > { %790 = vmatprep.subr.bf16.mxu0 %v789_v13  ;;  %812 = vmatprep.subr.bf16.mxu1 %v789_v13  ;;  %p977_p5 = pnand %p976_p0, %p970_p8 }
  0x6c   : > { %792 = vmatpush3.bf16.msra.mxu0 %v789_v13  ;;  %820 = vmatpush3.bf16.msra.mxu1 %v789_v13 }
  0x6d   : > { %794 = vmatprep.subr.bf16.mxu0 %v793_v16  ;;  %813 = vmatprep.subr.bf16.mxu1 %v793_v16 }
  0x70   : > { %796 = vmatpush3.bf16.msra.mxu0 %v793_v16  ;;  %821 = vmatpush3.bf16.msra.mxu1 %v793_v16 }
  0x71   : > { %798 = vmatprep.subr.bf16.mxu0 %v797_v19  ;;  %814 = vmatprep.subr.bf16.mxu1 %v797_v19 }
  0x74   : > { %800 = vmatpush3.bf16.msra.mxu0 %v797_v19  ;;  %822 = vmatpush3.bf16.msra.mxu1 %v797_v19 }
  0x75   : > { %802 = vmatprep.subr.bf16.mxu0 %v801_v22  ;;  %815 = vmatprep.subr.bf16.mxu1 %v801_v22 }
  0x78   : > { %804 = vmatpush3.bf16.msra.mxu0 %v801_v22  ;;  %823 = vmatpush3.bf16.msra.mxu1 %v801_v22 }
  0x79   : > { %806 = vmatprep.subr.bf16.mxu0 %v805_v25  ;;  %816 = vmatprep.subr.bf16.mxu1 %v805_v25 }
  0x7c   : > { %808 = vmatpush3.bf16.msra.mxu0 %v805_v25  ;;  %824 = vmatpush3.bf16.msra.mxu1 %v805_v25 }
  0x7f   : > { %766 = vmatmul.mubr.f32.vlgmr.msra.gmra.mrb[0].mxu0 %v283_v26  ;;  %772 = vmatmul.mubr.f32.vlgmr.msra.gmra.mrb[0].mxu1 %v287_v27 }
  0x80   : > { %768 = vmatprep.mubr.f32.mxu0 %v284_v28  ;;  %774 = vmatprep.mubr.f32.mxu1 %v288_v29 }
  0x83   : > { %769 = vmatmul.mubr.f32.gmra.mrb[2].mxu0 %v285_v30  ;;  %775 = vmatmul.mubr.f32.gmra.mrb[2].mxu1 %v289_v31 }
 0x152   : > { %v767_v33 = vpop.f32.mrb[0].mxu0  ;;  %v773_v34 = vpop.f32.mrb[0].mxu1 }
 0x153   : > { %v385_v35 = vadd.f32 %v767_v33, %v658_v32  ;;  %v405_v36 = vadd.f32 %v773_v34, %v658_v32  ;;  %v379_v37 = vpop.f32.mrb[1].mxu0  ;;  %v399_v38 = vpop.f32.mrb[1].mxu1 }
 0x154   : > { %v380_v39 = vadd.f32 %v658_v32, %v379_v37  ;;  %v400_v40 = vadd.f32 %v658_v32, %v399_v38 }
 0x155   : > { %419 = vst [vmem:[%s1310_s14 + $0x8] sm:$0xff] %v385_v35  ;;  %423 = vst [vmem:[%s1310_s14 + $0x28] sm:$0xff] %v405_v36 }
 0x156   : > { %418 = vst [vmem:[%s1310_s14] sm:$0xff] %v380_v39  ;;  %v689_v41 = vpack.c.bf16 %v385_v35, %v380_v39  ;;  %422 = vst [vmem:[%s1310_s14 + $0x20] sm:$0xff] %v400_v40  ;;  %v699_v42 = vpack.c.bf16 %v405_v36, %v400_v40  ;;  %v770_v43 = vpop.f32.mrb[2].mxu0  ;;  %v776_v44 = vpop.f32.mrb[2].mxu1 }
 0x157   : > { %v395_v45 = vadd.f32 %v770_v43, %v658_v32  ;;  %v415_v46 = vadd.f32 %v776_v44, %v658_v32  ;;  %v389_v47 = vpop.f32.mrb[3].mxu0  ;;  %v409_v48 = vpop.f32.mrb[3].mxu1 }
 0x158   : > { %690 = vst [vmem:[%s1313_s22] sm:$0xff] %v689_v41   ;;  %707 = vst [vmem:[%s1313_s22 + $0x10] sm:$0xff] %v699_v42   ;;  %v390_v49 = vadd.f32 %v658_v32, %v389_v47  ;;  %v410_v50 = vadd.f32 %v658_v32, %v409_v48 }
 0x159   : > { %421 = vst [vmem:[%s1310_s14 + $0x18] sm:$0xff] %v395_v45  ;;  %425 = vst [vmem:[%s1310_s14 + $0x38] sm:$0xff] %v415_v46 }
 0x15a   : > { %420 = vst [vmem:[%s1310_s14 + $0x10] sm:$0xff] %v390_v49  ;;  %v694_v51 = vpack.c.bf16 %v395_v45, %v390_v49  ;;  %424 = vst [vmem:[%s1310_s14 + $0x30] sm:$0xff] %v410_v50  ;;  %v704_v52 = vpack.c.bf16 %v415_v46, %v410_v50 }
 0x15b   : > { %980 = shalt.err (!%p977_p5)
}
 0x15c   : > { %s981_s14 = scalar_lea.hbm %s1329_s13, 1024  ;;  %s985_s11 = scalar_lea.hbm %s1418_s3, 2048 }
 0x15d   : > { %p982_p9 = scmp.ne.s32.totalorder %s1329_s13, %s981_s14  ;;  %p986_p3 = scmp.lt.u32.totalorder %s1329_s13, %s1418_s3 }
 0x15e   : > { %p987_p7 = scmp.lt.u32.totalorder %s985_s11, %s981_s14  ;;  %p989_p4 = scmp.lt.u32.totalorder %s981_s14, %s1329_s13 }
 0x15f   : > { %p983_p1 = pnand %p982_p9, %p1221_p10 }
 0x160   : > { %p988_p13 = por %p987_p7, %p986_p3 }
 0x161   : > { %p984_p2 = pneg %p983_p1 }
 0x162   : > { %p990_p6 = por %p989_p4, %p988_p13 }
 0x164   : > { %p991_p8 = pnand %p990_p6, %p984_p2 }
 0x166   : > { %994 = shalt.err (!%p991_p8)
}
 0x167   : > { %s1092_s23 = smov 128   ;;  %s1093_s25 = smov 8   ;;  %706 = vst [vmem:[%s1313_s22 + $0x8] sm:$0xff] %v694_v51   ;;  %708 = vst [vmem:[%s1313_s22 + $0x18] sm:$0xff] %v704_v52  }
 0x168   : > { %831 = dma.vmem_to_hbm [thread:$0]  (%p1221_p10), %s1318_s21, 1024, %s1329_s13, %s467_s8, %s1092_s23, %s1092_s23, %s1093_s25  }
 0x169   : > { %s472_s27 = scalar_lea.sflag [#allocation9], %s1280_s12  ;;  %s995_s6 = scalar_lea.vmem %s1322_s28, 512 }
 0x16a   : > { %p996_p12 = scmp.ne.s32.totalorder %s1322_s28, %s995_s6  ;;  %s1094_s14 = smov [#allocation8]  }
 0x16b   : > { %s999_s29 = sshll.u32 %s1094_s14, 4  ;;  %s1000_s29 = int_to_ptr.vmem [resolvable:$false] %s999_s29 }
 0x16c   : > { %p997_p11 = pnand %p996_p12, %p1221_p10  ;;  %s1001_s9 = scalar_lea.vmem %s1000_s29, 1024 }
 0x16d   : > { %p1002_p5 = scmp.lt.s32.totalorder %s1322_s28, %s1000_s29  ;;  %p1003_p9 = scmp.lt.s32.totalorder %s1001_s9, %s995_s6 }
 0x16e   : > { %p998_p0 = pneg %p997_p11 }
 0x16f   : > { %p1004_p1 = por %p1003_p9, %p1002_p5 }
 0x171   : > { %p1005_p2 = pnand %p1004_p1, %p998_p0 }
 0x173   : > { %1008 = shalt.err (!%p1005_p2)
}
 0x174   : > { %s1009_s21 = scalar_lea.hbm %s1338_s24, 512  ;;  %s1013_s8 = scalar_lea.hbm %s1419_s4, 1024 }
 0x175   : > { %p1010_p3 = scmp.ne.s32.totalorder %s1338_s24, %s1009_s21  ;;  %p1014_p4 = scmp.lt.u32.totalorder %s1338_s24, %s1419_s4 }
 0x176   : > { %p1015_p6 = scmp.lt.u32.totalorder %s1013_s8, %s1009_s21  ;;  %p1017_p12 = scmp.lt.u32.totalorder %s1009_s21, %s1338_s24 }
 0x177   : > { %p1011_p7 = pnand %p1010_p3, %p1221_p10 }
 0x178   : > { %p1016_p8 = por %p1015_p6, %p1014_p4 }
 0x179   : > { %p1012_p13 = pneg %p1011_p7 }
 0x17a   : > { %p1018_p11 = por %p1017_p12, %p1016_p8 }
 0x17c   : > { %p1019_p0 = pnand %p1018_p11, %p1012_p13 }
 0x17e   : > { %1022 = shalt.err (!%p1019_p0)
}
 0x17f   : > { %s1095_s7 = smov 64   ;;  %s1096_s23 = smov 4  }
 0x180   : > { %832 = dma.vmem_to_hbm [thread:$0]  (%p1221_p10), %s1322_s28, 512, %s1338_s24, %s472_s27, %s1095_s7, %s1095_s7, %s1096_s23  }
 0x181 PF: > { %s518_s25 = sand.u32 1, %s1065_s15   ;;  %p1437_p5 = scmp.ne.s32.totalorder %s1427_s26, 0 }
 0x182   : > { %p1438_p9 = scmp.ge.s32.totalorder %s1085_s20, 2  ;;  %s519_s6 = scalar_lea.sflag [#allocation4], %s518_s25 }
 0x184   : > { %p844_p1 = pnand %p1438_p9, %p1437_p5 }
 0x186   : > { %1056 = dma.done.wait (!%p844_p1), %s519_s6, 1024  }
 0x187   : > { %1058 = vsyncadd (!%p844_p1), %s519_s6, 4294966272  ;;  %s528_s14 = scalar_lea.sflag [#allocation9], %s518_s25 }
 0x188   : > { %1060 = dma.done.wait (!%p844_p1), %s528_s14, 512  }
 0x189   : > { %1062 = vsyncadd (!%p844_p1), %s528_s14, 4294966784  ;;  %s25_s20 = sadd.s32 1, %s1085_s20   ;;  %s1439_s15 = smov %s1069_s16 }
 0x18a   : > { %p22_p2 = scmp.ge.s32.totalorder %s25_s20, 4   ;;  %s1440_s16 = smov %s1073_s17 }
 0x18b   : > { %s1441_s17 = smov %s1230_s10  ;;  %s1442_s18 = smov %s1081_s19 }
 0x18c   : > { %s1443_s19 = smov %s1445_s5  ;;  %24 = sbr.rel (!%p22_p2) target bundleno = 9 (0x9), region = 102 }
 0x193   :  { %533 = vsyncpa [#allocation3], 1 }
 0x194   :  { %535 = vsyncpa [#allocation3 + $0x1], 1 }
 0x195   :  { %536 = vsyncpa [#allocation6], 1 }
 0x196   :  { %537 = vsyncpa [#allocation4], 1 }
 0x197   :  { %539 = vsyncpa [#allocation4 + $0x1], 1 }
 0x198   :  { %540 = vsyncpa [#allocation9], 1 }
 0x199   :  { %542 = vsyncpa [#allocation9 + $0x1], 1 }

</bundles_post_ra>
